<compile_context>
chip_gen: v7x
topology: tpu7x:2x2x1
jax: 0.10.0
libtpu: 0.0.40
codegen_flags: <defaults>
</compile_context>

<pallas_src>
import math
import jax
import jax.numpy as jnp
from jax.experimental import pallas as pl
from jax.experimental.pallas import tpu as pltpu

DROPOUT_P = 0.6


def lstm_cell_kernel(xh_ref, c_ref, w_ref, b_ref, drop_ref, hc_out_ref):
    """One LSTM-cell step, all four gates in a single MXU matmul.

    xh_ref  : (B, D+H)   concatenated [x | h_{t-1}]
    c_ref   : (B, H)     previous cell state
    w_ref   : (D+H, 4H)  fused weights [[W_f W_i W_o W_c]; [U_f U_i U_o U_c]]
    b_ref   : (1, 4H)    fused biases  [b1 | b2 | b3 | b4]
    drop_ref: (B, H)     pre-scaled dropout mask (0 or 1/(1-p))
    hc_out  : (B, 2H)    [h_t | c_t]
    """
    xh = xh_ref[...]
    c_prev = c_ref[...]
    H = c_prev.shape[-1]

    # Single fused matmul: (B, D+H) @ (D+H, 4H) + (1, 4H)
    gates = (jnp.dot(xh, w_ref[...], preferred_element_type=jnp.float32)
             + b_ref[...])

    f_t = jax.nn.sigmoid(gates[:, 0 * H:1 * H])
    i_t = jax.nn.sigmoid(gates[:, 1 * H:2 * H])
    o_t = jax.nn.sigmoid(gates[:, 2 * H:3 * H])
    g_t = jnp.tanh(gates[:, 3 * H:4 * H])

    c_t = c_prev * f_t + i_t * g_t
    h_t = o_t * jnp.tanh(c_t)

    # Dropout (training-mode F.dropout): multiply by pre-scaled keep mask.
    h_t = h_t * drop_ref[...]

    # Single lane-dense output slab [h | c].
    hc_out_ref[...] = jnp.concatenate([h_t, c_t], axis=-1).astype(hc_out_ref.dtype)


def lstm_forward(params, x, hidden, pre_cell, dropout_key):
    """One LSTM-cell step. x:(B,*,D), hidden:(B,*,H), pre_cell:(B,*,H).
    Returns (h_t, c_t), each of shape (B, 1, H)."""
    B = x.shape[0]
    x2 = x.reshape(B, -1).astype(jnp.float32)
    h2 = hidden.reshape(B, -1).astype(jnp.float32)
    c2 = pre_cell.reshape(B, -1).astype(jnp.float32)
    H = params["u_f"].shape[0]

    # Fused inputs (packed once per call; for a real model pre-pack the weights).
    xh = jnp.concatenate([x2, h2], axis=1)                              # (B, D+H)
    w_x = jnp.concatenate([params["w_f"], params["w_i"],
                           params["w_o"], params["w_c"]], axis=1)       # (D, 4H)
    w_h = jnp.concatenate([params["u_f"], params["u_i"],
                           params["u_o"], params["u_c"]], axis=1)       # (H, 4H)
    w_fused = jnp.concatenate([w_x, w_h], axis=0).astype(jnp.float32)   # (D+H, 4H)
    b_fused = jnp.concatenate([params["bias1"], params["bias2"],
                               params["bias3"], params["bias4"]]
                              ).reshape(1, 4 * H).astype(jnp.float32)   # (1, 4H)

    # Dropout mask generated host-side with jax.random (training-mode
    # semantics: zero w.p. p, survivors scaled by 1/(1-p)).  The torch RNG
    # stream cannot be bit-matched; probabilities are identical.
    keep = jax.random.bernoulli(dropout_key, 1.0 - DROPOUT_P, (B, H))
    drop_mask = keep.astype(jnp.float32) * (1.0 / (1.0 - DROPOUT_P))    # (B, H)

    vmem_spec = pl.BlockSpec(memory_space=pltpu.MemorySpace.VMEM)

    hc = pl.pallas_call(
        lstm_cell_kernel,
        out_shape=jax.ShapeDtypeStruct((B, 2 * H), jnp.float32),
        in_specs=[vmem_spec] * 5,
        out_specs=vmem_spec,
    )(xh, c2, w_fused, b_fused, drop_mask)

    h_t = hc[:, :H].reshape(B, 1, H)
    c_t = hc[:, H:].reshape(B, 1, H)
    return h_t, c_t

# TODO(synk): if this cell is driven over a time sequence, move the time loop
# inside the kernel (grid=(T,), weights resident via a constant index_map,
# h/c carried in VMEM scratch) to amortize weight DMA and launch overhead.


def init_params(key, input_size, hidden_size):
    stdv = 1.0 / math.sqrt(hidden_size)
    names_shapes = [
        ("w_i", (hidden_size, input_size)),
        ("w_f", (hidden_size, input_size)),
        ("w_o", (hidden_size, input_size)),
        ("w_c", (hidden_size, input_size)),
        ("u_i", (hidden_size, hidden_size)),
        ("u_f", (hidden_size, hidden_size)),
        ("u_o", (hidden_size, hidden_size)),
        ("u_c", (hidden_size, hidden_size)),
        ("bias1", (hidden_size,)),
        ("bias2", (hidden_size,)),
        ("bias3", (hidden_size,)),
        ("bias4", (hidden_size,)),
    ]
    params = {}
    keys = jax.random.split(key, len(names_shapes))
    for k, (name, shape) in zip(keys, names_shapes):
        params[name] = jax.random.uniform(
            k, shape, dtype=jnp.float32, minval=-stdv, maxval=stdv)
    return params


if __name__ == "__main__":
    # torch.mm(input, w_f) with w_f:(H, D) un-transposed requires D == H.
    INPUT_SIZE = 32
    HIDDEN_SIZE = 32
    BATCH = 2

    key = jax.random.PRNGKey(0)
    kp, kx, kh, kc, kd = jax.random.split(key, 5)

    params = init_params(kp, INPUT_SIZE, HIDDEN_SIZE)
    x = jax.random.normal(kx, (BATCH, 1, INPUT_SIZE), dtype=jnp.float32)
    hidden = jax.random.normal(kh, (BATCH, 1, HIDDEN_SIZE), dtype=jnp.float32)
    pre_cell = jax.random.normal(kc, (BATCH, 1, HIDDEN_SIZE), dtype=jnp.float32)

    h_t, c_t = lstm_forward(params, x, hidden, pre_cell, dropout_key=kd)
    jax.block_until_ready((h_t, c_t))

    assert h_t.shape == (BATCH, 1, HIDDEN_SIZE)
    assert c_t.shape == (BATCH, 1, HIDDEN_SIZE)
    assert bool(jnp.all(jnp.isfinite(h_t))) and bool(jnp.all(jnp.isfinite(c_t)))
    print("KERNEL_OK")
</pallas_src>

<mosaic_0001>
module attributes {stable_mosaic.version = 11 : i64} {
  func.func @lstm_cell_kernel(%arg0: memref<2x64xf32, #tpu.memory_space<vmem>>, %arg1: memref<2x32xf32, #tpu.memory_space<vmem>>, %arg2: memref<64x128xf32, #tpu.memory_space<vmem>>, %arg3: memref<1x128xf32, #tpu.memory_space<vmem>>, %arg4: memref<2x32xf32, #tpu.memory_space<vmem>>, %arg5: memref<2x64xf32, #tpu.memory_space<vmem>>) attributes {dimension_semantics = [], scalar_prefetch = 0 : i64, scratch_operands = 0 : i64, tpu.core_type = #tpu.core_type<tc>} {
    %c0 = arith.constant 0 : index
    %c0_0 = arith.constant 0 : index
    %0 = vector.load %arg0[%c0, %c0_0] : memref<2x64xf32, #tpu.memory_space<vmem>>, vector<2x64xf32>
    %c0_1 = arith.constant 0 : index
    %c0_2 = arith.constant 0 : index
    %1 = vector.load %arg1[%c0_1, %c0_2] : memref<2x32xf32, #tpu.memory_space<vmem>>, vector<2x32xf32>
    %c0_3 = arith.constant 0 : index
    %c0_4 = arith.constant 0 : index
    %2 = vector.load %arg2[%c0_3, %c0_4] : memref<64x128xf32, #tpu.memory_space<vmem>>, vector<64x128xf32>
    %cst = arith.constant dense<0.000000e+00> : vector<2x128xf32>
    %3 = tpu.matmul %0, %2, %cst {dimension_numbers = #tpu.dot_dimension_numbers<[1], [0], [0], [1], [0, 0, 1, 1], [], []>} : vector<2x64xf32>, vector<64x128xf32>, vector<2x128xf32> -> vector<2x128xf32>
    %c0_5 = arith.constant 0 : index
    %c0_6 = arith.constant 0 : index
    %4 = vector.load %arg3[%c0_5, %c0_6] : memref<1x128xf32, #tpu.memory_space<vmem>>, vector<1x128xf32>
    %5 = vector.broadcast %4 : vector<1x128xf32> to vector<2x128xf32>
    %6 = arith.addf %3, %5 : vector<2x128xf32>
    %7 = vector.extract_strided_slice %6 {offsets = [0, 0], sizes = [2, 32], strides = [1, 1]} : vector<2x128xf32> to vector<2x32xf32>
    %8 = arith.negf %7 : vector<2x32xf32>
    %9 = math.exp %8 : vector<2x32xf32>
    %cst_7 = arith.constant 1.000000e+00 : f32
    %10 = vector.broadcast %cst_7 : f32 to vector<2x32xf32>
    %11 = arith.addf %10, %9 : vector<2x32xf32>
    %12 = arith.divf %10, %11 : vector<2x32xf32>
    %13 = vector.extract_strided_slice %6 {offsets = [0, 32], sizes = [2, 32], strides = [1, 1]} : vector<2x128xf32> to vector<2x32xf32>
    %14 = arith.negf %13 : vector<2x32xf32>
    %15 = math.exp %14 : vector<2x32xf32>
    %cst_8 = arith.constant 1.000000e+00 : f32
    %16 = vector.broadcast %cst_8 : f32 to vector<2x32xf32>
    %17 = arith.addf %16, %15 : vector<2x32xf32>
    %18 = arith.divf %16, %17 : vector<2x32xf32>
    %19 = vector.extract_strided_slice %6 {offsets = [0, 64], sizes = [2, 32], strides = [1, 1]} : vector<2x128xf32> to vector<2x32xf32>
    %20 = arith.negf %19 : vector<2x32xf32>
    %21 = math.exp %20 : vector<2x32xf32>
    %cst_9 = arith.constant 1.000000e+00 : f32
    %22 = vector.broadcast %cst_9 : f32 to vector<2x32xf32>
    %23 = arith.addf %22, %21 : vector<2x32xf32>
    %24 = arith.divf %22, %23 : vector<2x32xf32>
    %25 = vector.extract_strided_slice %6 {offsets = [0, 96], sizes = [2, 32], strides = [1, 1]} : vector<2x128xf32> to vector<2x32xf32>
    %26 = math.tanh %25 : vector<2x32xf32>
    %27 = arith.mulf %1, %12 : vector<2x32xf32>
    %28 = arith.mulf %18, %26 : vector<2x32xf32>
    %29 = arith.addf %27, %28 : vector<2x32xf32>
    %30 = math.tanh %29 : vector<2x32xf32>
    %31 = arith.mulf %24, %30 : vector<2x32xf32>
    %c0_10 = arith.constant 0 : index
    %c0_11 = arith.constant 0 : index
    %32 = vector.load %arg4[%c0_10, %c0_11] : memref<2x32xf32, #tpu.memory_space<vmem>>, vector<2x32xf32>
    %33 = arith.mulf %31, %32 : vector<2x32xf32>
    %34 = tpu.concatenate %33, %29 in 1 : vector<2x32xf32>, vector<2x32xf32> -> vector<2x64xf32>
    %c0_12 = arith.constant 0 : index
    %c0_13 = arith.constant 0 : index
    %35 = vector.load %arg5[%c0_12, %c0_13] : memref<2x64xf32, #tpu.memory_space<vmem>>, vector<2x64xf32>
    tpu.vector_store %arg5[%c0_12, %c0_13], %34 {strides = array<i32>} : memref<2x64xf32, #tpu.memory_space<vmem>>, vector<2x64xf32>,
    return
  }
}

</mosaic_0001>

<bundles_post_ra>
// kernel: tpu_custom_call.1
= control target key start
LH: loop header
LB: loop body
LE: loop exit
PB: predicated region body
PF: predicated region fallthrough
CT: control target
= control target key end

     0   :  { %10 = vsyncpa [#allocation3], 0  ;;  %s423_s0 = inlined_call_operand.hbm [shape: f32[2,64], index: 0, kind: input, shape index: {}]   ;;  %s424_s1 = inlined_call_operand.vmem [shape: f32[2,32], index: 1, kind: input, shape index: {}]   ;;  %s425_s2 = inlined_call_operand.hbm [shape: f32[64,128], index: 2, kind: input, shape index: {}]   ;;  %s426_s3 = inlined_call_operand.vmem [shape: f32[1,128], index: 3, kind: input, shape index: {}]   ;;  %s427_s4 = inlined_call_operand.vmem [shape: f32[2,32], index: 4, kind: input, shape index: {}]   ;;  %s428_s5 = inlined_call_operand.hbm [shape: f32[2,64], index: 5, kind: output, shape index: {}]  }
   0x1   :  { %11 = vsyncpa [#allocation6], 0 }
   0x2   :  { %12 = vsyncpa [#allocation4], 0  ;;  %s330_s18 = smov [#allocation2]   ;;  %s331_s20 = smov [#allocation5]  }
   0x3   :  { %s19_s19 = sshll.u32 %s330_s18, 4  ;;  %s30_s21 = sshll.u32 %s331_s20, 4  ;;  %s20_s19 = int_to_ptr.vmem [resolvable:$true] %s19_s19  ;;  %s371_s21 = int_to_ptr.vmem [resolvable:$true] %s30_s21 }
   0x4   :  { %s258_s24 = scalar_lea.hbm %s423_s0, 32 }
   0x5   :  { %p259_p0 = scmp.ne.s32.totalorder %s423_s0, %s258_s24  ;;  %p262_p1 = scmp.lt.u32.totalorder %s258_s24, %s423_s0 }
   0x7   :  { %p264_p2 = pnand %p262_p1, %p259_p0 }
   0x9   :  { %267 = shalt.err (!%p264_p2)
}
   0xa   :  { %s268_s29 = scalar_lea.vmem %s20_s19, 32  ;;  %p273_p4 = scmp.lt.s32.totalorder %s20_s19, %s20_s19 }
   0xb   :  { %p269_p3 = scmp.ne.s32.totalorder %s20_s19, %s268_s29  ;;  %p274_p5 = scmp.lt.s32.totalorder %s268_s29, %s268_s29 }
   0xd   :  { %p275_p6 = por %p274_p5, %p273_p4 }
   0xf   :  { %p276_p7 = pnand %p275_p6, %p269_p3 }
  0x11   :  { %279 = shalt.err (!%p276_p7)
}
  0x12   :  { %22 = dma.hbm_to_vmem [thread:$0]  %s423_s0, 32, %s20_s19, [#allocation3]  }
  0x13   :  { %s280_s9 = scalar_lea.hbm %s425_s2, 1024 }
  0x14   :  { %p281_p8 = scmp.ne.s32.totalorder %s425_s2, %s280_s9  ;;  %p284_p9 = scmp.lt.u32.totalorder %s280_s9, %s425_s2 }
  0x16   :  { %p286_p10 = pnand %p284_p9, %p281_p8 }
  0x18   :  { %289 = shalt.err (!%p286_p10)
}
  0x19   :  { %s290_s14 = scalar_lea.vmem %s371_s21, 1024  ;;  %p295_p12 = scmp.lt.s32.totalorder %s371_s21, %s371_s21 }
  0x1a   :  { %p291_p11 = scmp.ne.s32.totalorder %s371_s21, %s290_s14  ;;  %p296_p13 = scmp.lt.s32.totalorder %s290_s14, %s290_s14 }
  0x1c   :  { %p297_p0 = por %p296_p13, %p295_p12 }
  0x1e   :  { %p298_p1 = pnand %p297_p0, %p291_p11 }
  0x20   :  { %301 = shalt.err (!%p298_p1)
}
  0x21   :  { %s332_s0 = smov 128   ;;  %s333_s15 = smov 8  }
  0x22   :  { %36 = dma.hbm_to_vmem [thread:$0]  %s425_s2, 1024, %s371_s21, [#allocation6], %s332_s0, %s332_s0, %s333_s15  }
  0x23   :  { %324 = dma.done.wait [#allocation3], 32  }
  0x24   :  { %325 = vsyncadd [#allocation3], 4294967264 }
  0x25   :  { %326 = dma.done.wait [#allocation6], 1024  }
  0x26   :  { %327 = vsyncadd [#allocation6], 4294966272  ;;  %v334_v0 = vmov 0.0|0.0   ;;  %vm335_vm0 = vmmov 0   ;;  %v336_v1 = vmov 0.0   ;;  %v49_v2 = vld [vmem:[#allocation5] sm:$0xff] }
  0x27   :  { %227 = vmatprep.subr.bf16.mxu0 %v334_v0  ;;  %224 = vmatprep.mubr.msk.f32.mxu0 %vm335_vm0, %v336_v1  ;;  %v50_v3 = vld [vmem:[#allocation5 + $0x8] sm:$0xff]  ;;  %v51_v4 = vld [vmem:[#allocation5 + $0x10] sm:$0xff]  ;;  %v52_v6 = vld [vmem:[#allocation5 + $0x18] sm:$0xff]  ;;  %vm64_vm1 = vcmask 523264   ;;  %s337_s19 = smov 64   ;;  %s338_s20 = smov 96  }
  0x28   :  { %v228_v5 = vpack.c.bf16 %v50_v3, %v49_v2  ;;  %v231_v7 = vpack.c.bf16 %v52_v6, %v51_v4  ;;  %v53_v8 = vld [vmem:[#allocation5 + $0x20] sm:$0xff]  ;;  %v54_v9 = vld [vmem:[#allocation5 + $0x28] sm:$0xff]  ;;  %v55_v11 = vld [vmem:[#allocation5 + $0x30] sm:$0xff]  ;;  %s339_s24 = smov 32   ;;  %s340_s25 = smov [#allocation7]   ;;  %vm176_vm2 = vcmask 261120  }
  0x29   :  { %v234_v10 = vpack.c.bf16 %v54_v9, %v53_v8  ;;  %v56_v12 = vld [vmem:[#allocation5 + $0x38] sm:$0xff]  ;;  %vm178_vm3 = vcmask 517120  }
  0x2a   :  { %229 = vmatpush3.bf16.msra.mxu0 %v228_v5  ;;  %v237_v13 = vpack.c.bf16 %v56_v12, %v55_v11  ;;  %v47_v14 = vld [vmem:[#allocation2] sm:$0x3] }
  0x2b   :  { %230 = vmatprep.subr.bf16.mxu0 %v334_v0  ;;  %v196_v15 = vld [vmem:[%s426_s3] ss:$0 sm:$0xff] }
  0x2c   :  { %v48_v26 = vld [vmem:[%s424_s1] sm:$0x3]  ;;  %s186_s1 = sshll.u32 %s340_s25, 4  ;;  %s187_s1 = int_to_ptr.vmem [resolvable:$true] %s186_s1 }
  0x2d   :  { %v162_v31 = vld [vmem:[%s427_s4] sm:$0x3]  ;;  %s302_s26 = scalar_lea.vmem %s187_s1, 32  ;;  %p307_p3 = scmp.lt.s32.totalorder %s187_s1, %s187_s1 }
  0x2e   :  { %232 = vmatpush3.bf16.msra.mxu0 %v231_v7  ;;  %p303_p2 = scmp.ne.s32.totalorder %s187_s1, %s302_s26  ;;  %p308_p4 = scmp.lt.s32.totalorder %s302_s26, %s302_s26 }
  0x2f   :  { %233 = vmatprep.subr.bf16.mxu0 %v334_v0 }
  0x30   :  { %p309_p5 = por %p308_p4, %p307_p3 }
  0x32   :  { %235 = vmatpush3.bf16.msra.mxu0 %v234_v10  ;;  %p310_p6 = pnand %p309_p5, %p303_p2 }
  0x33   :  { %236 = vmatprep.subr.bf16.mxu0 %v334_v0 }
  0x36   :  { %238 = vmatpush3.bf16.msra.mxu0 %v237_v13 }
  0x39   :  { %225 = vmatmul.mubr.msk.f32.vlgmr.msra.gmra.mrb[0].mxu0 %vm64_vm1, %v47_v14 }
 0x10c   :  { %v134_v16 = vpop.f32.mrb[0].mxu0 }
 0x10d   :  { %v135_v17 = vadd.f32 %v196_v15, %v134_v16  ;;  %v226_v18 = vpop.f32.mrb[1].mxu0 }
 0x10f   :  { %250 = vtanh.f32 %v135_v17  ;;  %v198_v20 = vmul.f32 -1.442695, %v135_v17 }
 0x111   :  { %252 = vpow2.f32 %v198_v20 }
 0x119   :  { %v251_v19 = vpop.eup %250 }
 0x11a   :  { %147 = vrot.lane.b32.xlu0 %v251_v19, %s337_s19 }
 0x11b   :  { %v253_v21 = vpop.eup %252 }
 0x11c   :  { %v141_v22 = vadd.f32 1.0, %v253_v21 }
 0x11e   :  { %254 = vrcp.f32 %v141_v22 }
 0x128   :  { %v255_v23 = vpop.eup %254 }
 0x129   :  { %v145_v27 = vmul.f32 %v255_v23, %v48_v26 }
 0x18c   :  { %v148_v24 = vpop.permute.xlu0 %147 }
 0x18d   :  { %v150_v25 = vmul.f32 %v255_v23, %v148_v24 }
 0x18f   :  { %152 = vrot.lane.b32.xlu0 %v150_v25, %s338_s20 }
 0x201   :  { %v153_v28 = vpop.permute.xlu0 %152 }
 0x202   :  { %v155_v29 = vadd.f32 %v153_v28, %v145_v27 }
 0x204   :  { %256 = vtanh.f32 %v155_v29 }
 0x20e   :  { %v257_v30 = vpop.eup %256 }
 0x20f   :  { %158 = vrot.lane.b32.xlu1 %v257_v30, %s337_s19 }
 0x213   :  { %164 = vrot.lane.b32.xlu1 %v162_v31, %s337_s19 }
 0x217   :  { %173 = vrot.lane.b32.xlu1 %v155_v29, %s339_s24 }
 0x281   :  { %v159_v32 = vpop.permute.xlu1 %158 }
 0x282   :  { %v161_v33 = vmul.f32 %v255_v23, %v159_v32 }
 0x285   :  { %v165_v34 = vpop.permute.xlu1 %164 }
 0x286   :  { %v167_v35 = vmul.f32 %v165_v34, %v161_v33 }
 0x288   :  { %169 = vrot.lane.b32.xlu0 %v167_v35, %s337_s19 }
 0x289   :  { %v174_v36 = vpop.permute.xlu1 %173 }
 0x2fa   :  { %v170_v37 = vpop.permute.xlu0 %169 }
 0x2fb   :  { %v177_v38 = vsel %vm176_vm2, %v170_v37, %v174_v36 }
 0x2fc   :  { %179 = vst.msk [vmem:[#allocation7] sm:$0x3] %vm178_vm3, %v177_v38 }
 0x2fd   :  { %313 = shalt.err (!%p310_p6)
}
 0x2fe   :  { %s314_s28 = scalar_lea.hbm %s428_s5, 32 }
 0x2ff   :  { %p315_p7 = scmp.ne.s32.totalorder %s428_s5, %s314_s28  ;;  %p318_p8 = scmp.lt.u32.totalorder %s314_s28, %s428_s5 }
 0x301   :  { %p320_p9 = pnand %p318_p8, %p315_p7 }
 0x303   :  { %323 = shalt.err (!%p320_p9)
}
 0x304   :  { %189 = dma.vmem_to_hbm [thread:$0]  %s187_s1, 32, %s428_s5, [#allocation4]  }
 0x305   :  { %328 = dma.done.wait [#allocation4], 32  }
 0x306   :  { %329 = vsyncadd [#allocation4], 4294967264 }
 0x307   :  { %193 = vsyncpa [#allocation3], 1 }
 0x308   :  { %194 = vsyncpa [#allocation6], 1 }
 0x309   :  { %195 = vsyncpa [#allocation4], 1 }

</bundles_post_ra>
